<compile_context>
chip_gen: v6e
topology: v6e:2x2x1
jax: 0.10.0
libtpu: 0.0.40
codegen_flags: <defaults>
</compile_context>

<pallas_src>
import math

import jax
import jax.numpy as jnp
from jax.experimental import pallas as pl
from jax.experimental.pallas import tpu as pltpu

EMBEDDING_SIZE = 32
BN_EPS = 1e-5

# (C_in, C_out, kernel, stride) for conv1..conv5
_CONV_CFG = [
    (2, EMBEDDING_SIZE, 5, 1),
    (EMBEDDING_SIZE, EMBEDDING_SIZE * 2, 3, 2),
    (EMBEDDING_SIZE * 2, EMBEDDING_SIZE, 3, 1),
    (EMBEDDING_SIZE, EMBEDDING_SIZE, 3, 1),
    (EMBEDDING_SIZE, EMBEDDING_SIZE, 1, 1),
]


# --------------------------------------------------------------------------
# Kernels
# --------------------------------------------------------------------------
def _im2col(x, k):
    """Concatenate k shifted row-slices along the lane axis -> (L-k+1, k*C)."""
    if k == 1:
        return x
    l_out = x.shape[0] - k + 1
    return jnp.concatenate([x[t:t + l_out, :] for t in range(k)], axis=1)


def _stride2_cols(x):
    """x rows are packed pairs [x1[2i] | x1[2i+1]] (width 2C).  The taps of the
    stride-2, K=3 conv are then static slices: rows j (all 2C lanes) ++ rows
    j+1 (first C lanes)."""
    c = x.shape[1] // 2
    l_out = x.shape[0] - 1
    return jnp.concatenate([x[:l_out, :], x[1:1 + l_out, :c]], axis=1)


def _embedding_net_kernel(x_ref, w1, b1, w2, b2, w3, b3, w4, b4, w5, b5,
                          sc5, sh5, o_ref):
    tb = x_ref.shape[0]          # samples per grid step

    def layer(xs, cols_fn, w_ref, b_ref):
        # im2col each sample, stack along the matmul M axis, one MXU matmul,
        # conv bias + ReLU, split back per sample.
        cols = [cols_fn(v) for v in xs]
        m = cols[0] if tb == 1 else jnp.concatenate(cols, axis=0)
        y = jnp.dot(m, w_ref[...], preferred_element_type=jnp.float32)
        y = jnp.maximum(y + b_ref[...], 0.0)
        l_out = cols[0].shape[0]
        return [y[s * l_out:(s + 1) * l_out, :] for s in range(tb)]

    # x_ref[s]: (L/2 - 2, 12) host-side im2col of the pair-packed input.
    xs = [x_ref[s].astype(jnp.float32) for s in range(tb)]
    xs = layer(xs, lambda v: v, w1, b1)               # conv1 -> (L/2-2, 64) pairs
    xs = layer(xs, _stride2_cols, w2, b2)             # conv2 (stride 2) -> (.., 64)
    xs = layer(xs, lambda v: _im2col(v, 3), w3, b3)   # conv3 -> (.., 32)
    xs = layer(xs, lambda v: _im2col(v, 3), w4, b4)   # conv4 -> (.., 32)
    xs = layer(xs, lambda v: v, w5, b5)               # conv5 (K=1) -> (.., 32)

    # layer-5 eval-mode BatchNorm + global max-pool over length.
    pooled = [jnp.max(v * sc5[...] + sh5[...], axis=0, keepdims=True) for v in xs]
    o_ref[...] = pooled[0] if tb == 1 else jnp.concatenate(pooled, axis=0)


def _fullnet_head_kernel(e_ref, w_ref, b_ref, o_ref):
    """Linear(64, 2) + LogSoftmax(dim=1) on concatenated embeddings."""
    s = jnp.dot(e_ref[...], w_ref[...],
                preferred_element_type=jnp.float32) + b_ref[...]
    m = jnp.max(s, axis=-1, keepdims=True)
    z = s - m
    o_ref[...] = z - jnp.log(jnp.sum(jnp.exp(z), axis=-1, keepdims=True))


# --------------------------------------------------------------------------
# Parameter construction (host side)
# --------------------------------------------------------------------------
def init_embedding_params(key):
    """PyTorch-style init; returns (key, raw) with PyTorch-layout conv tensors
    plus eval-mode BatchNorm statistics for each layer."""
    raw = []
    for (c_in, c_out, k, stride) in _CONV_CFG:
        key, k1, k2, k3, k4, k5, k6 = jax.random.split(key, 7)
        bound = 1.0 / math.sqrt(c_in * k)
        raw.append(dict(
            w=jax.random.uniform(k1, (c_out, c_in, k), jnp.float32, -bound, bound),
            b=jax.random.uniform(k2, (c_out,), jnp.float32, -bound, bound),
            gamma=1.0 + 0.1 * jax.random.normal(k3, (c_out,), jnp.float32),
            beta=0.1 * jax.random.normal(k4, (c_out,), jnp.float32),
            mean=0.1 * jax.random.normal(k5, (c_out,), jnp.float32),
            var=jax.random.uniform(k6, (c_out,), jnp.float32, 0.5, 1.5),
            stride=stride, ksize=k))
    return key, raw


def build_kernel_params(raw):
    """Host-side preprocessing: fold BN(1..4) into the next conv, pair-pack
    conv1's weight for the stride-2 layout, reshape all weights to
    (K*C_in, C_out)."""
    wk = [jnp.transpose(p["w"], (2, 1, 0)) for p in raw]        # (K, C_in, C_out)
    bias = [p["b"] for p in raw]
    scale = [p["gamma"] / jnp.sqrt(p["var"] + BN_EPS) for p in raw]
    shift = [p["beta"] - p["mean"] * s for p, s in zip(raw, scale)]

    fw = [wk[0]]
    fb = [bias[0]]
    for i in range(1, 5):
        # (scale*r + shift) @ W == r @ (diag(scale) W) + shift @ W
        fw.append(wk[i] * scale[i - 1][None, :, None])
        fb.append(bias[i] + jnp.einsum("c,kcd->d", shift[i - 1], wk[i]))

    # conv1: emit packed pairs [x1[2i] | x1[2i+1]] straight from the pair-packed
    # input: packed slot s holds input time step 2i+s (2 channels each).
    w1 = fw[0]                                                   # (5, 2, 32)
    c_out1 = w1.shape[-1]
    we = jnp.pad(w1, ((0, 1), (0, 0), (0, 0)))                   # taps at slots 0..4
    wo = jnp.pad(w1, ((1, 0), (0, 0), (0, 0)))                   # taps at slots 1..5
    w1p = jnp.concatenate([we.reshape(12, c_out1), wo.reshape(12, c_out1)], axis=1)
    b1p = jnp.concatenate([fb[0], fb[0]])[None, :]               # (1, 64)

    def flat(w):  # (K, C_in, C_out) -> (K*C_in, C_out), tap-major
        return w.reshape(w.shape[0] * w.shape[1], w.shape[2])

    return [w1p, b1p,
            flat(fw[1]), fb[1][None, :],
            flat(fw[2]), fb[2][None, :],
            flat(fw[3]), fb[3][None, :],
            flat(fw[4]), fb[4][None, :],
            scale[4][None, :], shift[4][None, :]]


# --------------------------------------------------------------------------
# Forward wrappers
# --------------------------------------------------------------------------
def embedding_net_forward(x_ncl, kernel_params, block_n=None):
    """x_ncl: (N, 2, L) float32 (PyTorch NCL). Returns ((N, 32, 1), None, None)."""
    n, c_in, length = x_ncl.shape
    assert c_in == 2
    assert length % 2 == 0 and length >= 26, "kernel assumes even L >= 26"
    if block_n is None:
        # keep >= 2 parallel grid steps when N >= 2 (v7x has 2 TensorCores)
        block_n = max(1, (n + 1) // 2)
    n_blocks = pl.cdiv(n, block_n)
    n_pad = n_blocks * block_n

    x_nlc = jnp.transpose(x_ncl, (0, 2, 1)).astype(jnp.float32)   # (N, L, 2)
    if n_pad != n:
        x_nlc = jnp.pad(x_nlc, ((0, n_pad - n), (0, 0), (0, 0)))
    # Pair-pack consecutive time steps into channels and im2col conv1 on the
    # host (free preprocessing): (N, L, 2) -> (N, L/2, 4) -> (N, L/2-2, 12).
    xp = x_nlc.reshape(n_pad, length // 2, 4)
    l1 = length // 2 - 2
    xcols = jnp.concatenate([xp[:, t:t + l1, :] for t in range(3)], axis=-1)

    inputs = [xcols]
    in_specs = [pl.BlockSpec((block_n, l1, 12), lambda i: (i, 0, 0))]
    for p in kernel_params:
        inputs.append(p)
        in_specs.append(pl.BlockSpec(p.shape, lambda i, _nd=p.ndim: (0,) * _nd))

    out = pl.pallas_call(
        _embedding_net_kernel,
        out_shape=jax.ShapeDtypeStruct((n_blocks, block_n, EMBEDDING_SIZE),
                                       jnp.float32),
        grid_spec=pltpu.PrefetchScalarGridSpec(
            num_scalar_prefetch=0,
            grid=(n_blocks,),
            in_specs=in_specs,
            out_specs=pl.BlockSpec((None, block_n, EMBEDDING_SIZE),
                                   lambda i: (i, 0, 0)),
        ),
        compiler_params=pltpu.CompilerParams(
            dimension_semantics=("parallel",)),
    )(*inputs)

    emb = out.reshape(n_pad, EMBEDDING_SIZE)[:n]
    # (N, 32) -> (N, 32, 1) to match PyTorch max_pool1d output layout.
    return emb[:, :, None], None, None


def fullnet_forward(x_ncl, y_ncl, emb_params, ff_w, ff_b, block_n=None):
    x_emb, _, _ = embedding_net_forward(x_ncl, emb_params, block_n)
    y_emb, _, _ = embedding_net_forward(y_ncl, emb_params, block_n)
    feats = jnp.concatenate([x_emb[:, :, 0], y_emb[:, :, 0]], axis=1)  # (N, 64)
    # TODO(synk): nn.Dropout(0.4) is identity in eval mode and is not applied.
    logp = pl.pallas_call(
        _fullnet_head_kernel,
        out_shape=jax.ShapeDtypeStruct((feats.shape[0], 2), jnp.float32),
    )(feats, jnp.transpose(ff_w), ff_b[None, :])
    # TODO(synk): the PyTorch module computes y_translation - x_translation on
    # None values (would raise); we return (None, None) instead.
    return logp, (None, None)


# --------------------------------------------------------------------------
# Pure-JAX references (PyTorch semantics: conv -> +b -> ReLU -> eval BatchNorm)
# --------------------------------------------------------------------------
def reference_embedding(x_ncl, raw):
    x = x_ncl.astype(jnp.float32)
    for p in raw:
        x = jax.lax.conv_general_dilated(
            x, p["w"], window_strides=(p["stride"],), padding="VALID",
            dimension_numbers=("NCH", "OIH", "NCH"))
        x = jnp.maximum(x + p["b"][None, :, None], 0.0)
        inv = p["gamma"] / jnp.sqrt(p["var"] + BN_EPS)
        x = (x - p["mean"][None, :, None]) * inv[None, :, None] \
            + p["beta"][None, :, None]
    return jnp.max(x, axis=2, keepdims=True)                      # (N, 32, 1)


def reference_fullnet(x_ncl, y_ncl, raw, ff_w, ff_b):
    ex = reference_embedding(x_ncl, raw)[:, :, 0]
    ey = reference_embedding(y_ncl, raw)[:, :, 0]
    scores = jnp.concatenate([ex, ey], axis=1) @ ff_w.T + ff_b
    return jax.nn.log_softmax(scores, axis=1)


# --------------------------------------------------------------------------
if __name__ == "__main__":
    key = jax.random.PRNGKey(0)
    key, kx, ky = jax.random.split(key, 3)
    N, L = 2, 32
    x = jax.random.normal(kx, (N, 2, L), jnp.float32)   # PyTorch NCL inputs
    y = jax.random.normal(ky, (N, 2, L), jnp.float32)

    key, raw = init_embedding_params(key)
    kernel_params = build_kernel_params(raw)

    key, kfw, kfb = jax.random.split(key, 3)
    xav = math.sqrt(6.0 / (2 * EMBEDDING_SIZE + 2))      # xavier_uniform_ bound
    ff_w = jax.random.uniform(kfw, (2, 2 * EMBEDDING_SIZE), jnp.float32, -xav, xav)
    ff_b = jax.random.uniform(kfb, (2,), jnp.float32, -0.125, 0.125)

    # EmbeddingNet check
    emb, _, _ = embedding_net_forward(x, kernel_params)
    emb = jax.block_until_ready(emb)
    emb_ref = jax.block_until_ready(reference_embedding(x, raw))
    assert emb.shape == (N, EMBEDDING_SIZE, 1), emb.shape
    assert jnp.allclose(emb, emb_ref, rtol=1e-4, atol=2e-4), (
        float(jnp.max(jnp.abs(emb - emb_ref))))

    # FullNet check
    logp, _ = fullnet_forward(x, y, kernel_params, ff_w, ff_b)
    logp = jax.block_until_ready(logp)
    logp_ref = jax.block_until_ready(reference_fullnet(x, y, raw, ff_w, ff_b))
    assert logp.shape == (N, 2), logp.shape
    assert jnp.allclose(logp, logp_ref, rtol=1e-4, atol=2e-4), (
        float(jnp.max(jnp.abs(logp - logp_ref))))

    print("KERNEL_OK")
</pallas_src>

<mosaic_0001>
module attributes {stable_mosaic.version = 11 : i64} {
  func.func @_embedding_net_kernel(%arg0: i32, %arg1: memref<1x14x12xf32, #tpu.memory_space<vmem>>, %arg2: memref<12x64xf32, #tpu.memory_space<vmem>>, %arg3: memref<1x64xf32, #tpu.memory_space<vmem>>, %arg4: memref<96x64xf32, #tpu.memory_space<vmem>>, %arg5: memref<1x64xf32, #tpu.memory_space<vmem>>, %arg6: memref<192x32xf32, #tpu.memory_space<vmem>>, %arg7: memref<1x32xf32, #tpu.memory_space<vmem>>, %arg8: memref<96x32xf32, #tpu.memory_space<vmem>>, %arg9: memref<1x32xf32, #tpu.memory_space<vmem>>, %arg10: memref<32x32xf32, #tpu.memory_space<vmem>>, %arg11: memref<1x32xf32, #tpu.memory_space<vmem>>, %arg12: memref<1x32xf32, #tpu.memory_space<vmem>>, %arg13: memref<1x32xf32, #tpu.memory_space<vmem>>, %arg14: memref<1x1x32xf32, #tpu.memory_space<vmem>>) attributes {dimension_semantics = [#tpu.dimension_semantics<parallel>], iteration_bounds = array<i64: 2>, scalar_prefetch = 0 : i64, scratch_operands = 0 : i64, tpu.core_type = #tpu.core_type<tc>, window_params = [{transform_indices = @transform_0, window_bounds = array<i64: 1, 14, 12>}, {pipeline_mode = #tpu.pipeline_mode<synchronous>, transform_indices = @transform_1, window_bounds = array<i64: 12, 64>}, {pipeline_mode = #tpu.pipeline_mode<synchronous>, transform_indices = @transform_2, window_bounds = array<i64: 1, 64>}, {pipeline_mode = #tpu.pipeline_mode<synchronous>, transform_indices = @transform_3, window_bounds = array<i64: 96, 64>}, {pipeline_mode = #tpu.pipeline_mode<synchronous>, transform_indices = @transform_4, window_bounds = array<i64: 1, 64>}, {pipeline_mode = #tpu.pipeline_mode<synchronous>, transform_indices = @transform_5, window_bounds = array<i64: 192, 32>}, {pipeline_mode = #tpu.pipeline_mode<synchronous>, transform_indices = @transform_6, window_bounds = array<i64: 1, 32>}, {pipeline_mode = #tpu.pipeline_mode<synchronous>, transform_indices = @transform_7, window_bounds = array<i64: 96, 32>}, {pipeline_mode = #tpu.pipeline_mode<synchronous>, transform_indices = @transform_8, window_bounds = array<i64: 1, 32>}, {pipeline_mode = #tpu.pipeline_mode<synchronous>, transform_indices = @transform_9, window_bounds = array<i64: 32, 32>}, {pipeline_mode = #tpu.pipeline_mode<synchronous>, transform_indices = @transform_10, window_bounds = array<i64: 1, 32>}, {pipeline_mode = #tpu.pipeline_mode<synchronous>, transform_indices = @transform_11, window_bounds = array<i64: 1, 32>}, {pipeline_mode = #tpu.pipeline_mode<synchronous>, transform_indices = @transform_12, window_bounds = array<i64: 1, 32>}, {transform_indices = @transform_13, window_bounds = array<i64: 1, 1, 32>}]} {
    %c0 = arith.constant 0 : index
    %c0_0 = arith.constant 0 : index
    %c0_1 = arith.constant 0 : index
    %0 = vector.load %arg1[%c0, %c0_0, %c0_1] : memref<1x14x12xf32, #tpu.memory_space<vmem>>, vector<1x14x12xf32>
    %1 = vector.shape_cast %0 : vector<1x14x12xf32> to vector<14x12xf32>
    %c0_2 = arith.constant 0 : index
    %c0_3 = arith.constant 0 : index
    %2 = vector.load %arg2[%c0_2, %c0_3] : memref<12x64xf32, #tpu.memory_space<vmem>>, vector<12x64xf32>
    %cst = arith.constant dense<0.000000e+00> : vector<14x64xf32>
    %3 = tpu.matmul %1, %2, %cst {dimension_numbers = #tpu.dot_dimension_numbers<[1], [0], [0], [1], [0, 0, 1, 1], [], []>} : vector<14x12xf32>, vector<12x64xf32>, vector<14x64xf32> -> vector<14x64xf32>
    %c0_4 = arith.constant 0 : index
    %c0_5 = arith.constant 0 : index
    %4 = vector.load %arg3[%c0_4, %c0_5] : memref<1x64xf32, #tpu.memory_space<vmem>>, vector<1x64xf32>
    %5 = vector.broadcast %4 : vector<1x64xf32> to vector<14x64xf32>
    %6 = arith.addf %3, %5 : vector<14x64xf32>
    %cst_6 = arith.constant 0.000000e+00 : f32
    %7 = vector.broadcast %cst_6 : f32 to vector<14x64xf32>
    %8 = arith.maximumf %6, %7 : vector<14x64xf32>
    %9 = vector.extract_strided_slice %8 {offsets = [0, 0], sizes = [13, 64], strides = [1, 1]} : vector<14x64xf32> to vector<13x64xf32>
    %10 = vector.extract_strided_slice %8 {offsets = [1, 0], sizes = [13, 32], strides = [1, 1]} : vector<14x64xf32> to vector<13x32xf32>
    %11 = tpu.concatenate %9, %10 in 1 : vector<13x64xf32>, vector<13x32xf32> -> vector<13x96xf32>
    %c0_7 = arith.constant 0 : index
    %c0_8 = arith.constant 0 : index
    %12 = vector.load %arg4[%c0_7, %c0_8] : memref<96x64xf32, #tpu.memory_space<vmem>>, vector<96x64xf32>
    %cst_9 = arith.constant dense<0.000000e+00> : vector<13x64xf32>
    %13 = tpu.matmul %11, %12, %cst_9 {dimension_numbers = #tpu.dot_dimension_numbers<[1], [0], [0], [1], [0, 0, 1, 1], [], []>} : vector<13x96xf32>, vector<96x64xf32>, vector<13x64xf32> -> vector<13x64xf32>
    %c0_10 = arith.constant 0 : index
    %c0_11 = arith.constant 0 : index
    %14 = vector.load %arg5[%c0_10, %c0_11] : memref<1x64xf32, #tpu.memory_space<vmem>>, vector<1x64xf32>
    %15 = vector.broadcast %14 : vector<1x64xf32> to vector<13x64xf32>
    %16 = arith.addf %13, %15 : vector<13x64xf32>
    %cst_12 = arith.constant 0.000000e+00 : f32
    %17 = vector.broadcast %cst_12 : f32 to vector<13x64xf32>
    %18 = arith.maximumf %16, %17 : vector<13x64xf32>
    %19 = vector.extract_strided_slice %18 {offsets = [0, 0], sizes = [11, 64], strides = [1, 1]} : vector<13x64xf32> to vector<11x64xf32>
    %20 = vector.extract_strided_slice %18 {offsets = [1, 0], sizes = [11, 64], strides = [1, 1]} : vector<13x64xf32> to vector<11x64xf32>
    %21 = vector.extract_strided_slice %18 {offsets = [2, 0], sizes = [11, 64], strides = [1, 1]} : vector<13x64xf32> to vector<11x64xf32>
    %22 = tpu.concatenate %19, %20, %21 in 1 : vector<11x64xf32>, vector<11x64xf32>, vector<11x64xf32> -> vector<11x192xf32>
    %c0_13 = arith.constant 0 : index
    %c0_14 = arith.constant 0 : index
    %23 = vector.load %arg6[%c0_13, %c0_14] : memref<192x32xf32, #tpu.memory_space<vmem>>, vector<192x32xf32>
    %cst_15 = arith.constant dense<0.000000e+00> : vector<11x32xf32>
    %24 = tpu.matmul %22, %23, %cst_15 {dimension_numbers = #tpu.dot_dimension_numbers<[1], [0], [0], [1], [0, 0, 1, 1], [], []>} : vector<11x192xf32>, vector<192x32xf32>, vector<11x32xf32> -> vector<11x32xf32>
    %c0_16 = arith.constant 0 : index
    %c0_17 = arith.constant 0 : index
    %25 = vector.load %arg7[%c0_16, %c0_17] : memref<1x32xf32, #tpu.memory_space<vmem>>, vector<1x32xf32>
    %26 = vector.broadcast %25 : vector<1x32xf32> to vector<11x32xf32>
    %27 = arith.addf %24, %26 : vector<11x32xf32>
    %cst_18 = arith.constant 0.000000e+00 : f32
    %28 = vector.broadcast %cst_18 : f32 to vector<11x32xf32>
    %29 = arith.maximumf %27, %28 : vector<11x32xf32>
    %30 = vector.extract_strided_slice %29 {offsets = [0, 0], sizes = [9, 32], strides = [1, 1]} : vector<11x32xf32> to vector<9x32xf32>
    %31 = vector.extract_strided_slice %29 {offsets = [1, 0], sizes = [9, 32], strides = [1, 1]} : vector<11x32xf32> to vector<9x32xf32>
    %32 = vector.extract_strided_slice %29 {offsets = [2, 0], sizes = [9, 32], strides = [1, 1]} : vector<11x32xf32> to vector<9x32xf32>
    %33 = tpu.concatenate %30, %31, %32 in 1 : vector<9x32xf32>, vector<9x32xf32>, vector<9x32xf32> -> vector<9x96xf32>
    %c0_19 = arith.constant 0 : index
    %c0_20 = arith.constant 0 : index
    %34 = vector.load %arg8[%c0_19, %c0_20] : memref<96x32xf32, #tpu.memory_space<vmem>>, vector<96x32xf32>
    %cst_21 = arith.constant dense<0.000000e+00> : vector<9x32xf32>
    %35 = tpu.matmul %33, %34, %cst_21 {dimension_numbers = #tpu.dot_dimension_numbers<[1], [0], [0], [1], [0, 0, 1, 1], [], []>} : vector<9x96xf32>, vector<96x32xf32>, vector<9x32xf32> -> vector<9x32xf32>
    %c0_22 = arith.constant 0 : index
    %c0_23 = arith.constant 0 : index
    %36 = vector.load %arg9[%c0_22, %c0_23] : memref<1x32xf32, #tpu.memory_space<vmem>>, vector<1x32xf32>
    %37 = vector.broadcast %36 : vector<1x32xf32> to vector<9x32xf32>
    %38 = arith.addf %35, %37 : vector<9x32xf32>
    %cst_24 = arith.constant 0.000000e+00 : f32
    %39 = vector.broadcast %cst_24 : f32 to vector<9x32xf32>
    %40 = arith.maximumf %38, %39 : vector<9x32xf32>
    %c0_25 = arith.constant 0 : index
    %c0_26 = arith.constant 0 : index
    %41 = vector.load %arg10[%c0_25, %c0_26] : memref<32x32xf32, #tpu.memory_space<vmem>>, vector<32x32xf32>
    %cst_27 = arith.constant dense<0.000000e+00> : vector<9x32xf32>
    %42 = tpu.matmul %40, %41, %cst_27 {dimension_numbers = #tpu.dot_dimension_numbers<[1], [0], [0], [1], [0, 0, 1, 1], [], []>} : vector<9x32xf32>, vector<32x32xf32>, vector<9x32xf32> -> vector<9x32xf32>
    %c0_28 = arith.constant 0 : index
    %c0_29 = arith.constant 0 : index
    %43 = vector.load %arg11[%c0_28, %c0_29] : memref<1x32xf32, #tpu.memory_space<vmem>>, vector<1x32xf32>
    %44 = vector.broadcast %43 : vector<1x32xf32> to vector<9x32xf32>
    %45 = arith.addf %42, %44 : vector<9x32xf32>
    %cst_30 = arith.constant 0.000000e+00 : f32
    %46 = vector.broadcast %cst_30 : f32 to vector<9x32xf32>
    %47 = arith.maximumf %45, %46 : vector<9x32xf32>
    %c0_31 = arith.constant 0 : index
    %c0_32 = arith.constant 0 : index
    %48 = vector.load %arg12[%c0_31, %c0_32] : memref<1x32xf32, #tpu.memory_space<vmem>>, vector<1x32xf32>
    %49 = vector.broadcast %48 : vector<1x32xf32> to vector<9x32xf32>
    %50 = arith.mulf %47, %49 : vector<9x32xf32>
    %c0_33 = arith.constant 0 : index
    %c0_34 = arith.constant 0 : index
    %51 = vector.load %arg13[%c0_33, %c0_34] : memref<1x32xf32, #tpu.memory_space<vmem>>, vector<1x32xf32>
    %52 = vector.broadcast %51 : vector<1x32xf32> to vector<9x32xf32>
    %53 = arith.addf %50, %52 : vector<9x32xf32>
    %cst_35 = arith.constant dense<0xFF800000> : vector<32xf32>
    %54 = vector.multi_reduction <maximumf>, %53, %cst_35 [0] : vector<9x32xf32> to vector<32xf32>
    %55 = vector.shape_cast %54 : vector<32xf32> to vector<1x32xf32>
    %c0_36 = arith.constant 0 : index
    %c0_37 = arith.constant 0 : index
    %c0_38 = arith.constant 0 : index
    %56 = vector.load %arg14[%c0_36, %c0_37, %c0_38] : memref<1x1x32xf32, #tpu.memory_space<vmem>>, vector<1x1x32xf32>
    %57 = vector.shape_cast %56 : vector<1x1x32xf32> to vector<1x32xf32>
    %58 = vector.shape_cast %55 : vector<1x32xf32> to vector<1x1x32xf32>
    tpu.vector_store %arg14[%c0_36, %c0_37, %c0_38], %58 {strides = array<i32>} : memref<1x1x32xf32, #tpu.memory_space<vmem>>, vector<1x1x32xf32>,
    return
  }
  func.func @transform_0(%arg0: i32) -> (i32, i32, i32) {
    %c0_i32 = arith.constant 0 : i32
    %c0_i32_0 = arith.constant 0 : i32
    %c0_i32_1 = arith.constant 0 : i32
    return %arg0, %c0_i32, %c0_i32_0 : i32, i32, i32
  }
  func.func @transform_1(%arg0: i32) -> (i32, i32) {
    %c0_i32 = arith.constant 0 : i32
    %c0_i32_0 = arith.constant 0 : i32
    %c0_i32_1 = arith.constant 0 : i32
    return %c0_i32, %c0_i32_0 : i32, i32
  }
  func.func @transform_2(%arg0: i32) -> (i32, i32) {
    %c0_i32 = arith.constant 0 : i32
    %c0_i32_0 = arith.constant 0 : i32
    %c0_i32_1 = arith.constant 0 : i32
    return %c0_i32, %c0_i32_0 : i32, i32
  }
  func.func @transform_3(%arg0: i32) -> (i32, i32) {
    %c0_i32 = arith.constant 0 : i32
    %c0_i32_0 = arith.constant 0 : i32
    %c0_i32_1 = arith.constant 0 : i32
    return %c0_i32, %c0_i32_0 : i32, i32
  }
  func.func @transform_4(%arg0: i32) -> (i32, i32) {
    %c0_i32 = arith.constant 0 : i32
    %c0_i32_0 = arith.constant 0 : i32
    %c0_i32_1 = arith.constant 0 : i32
    return %c0_i32, %c0_i32_0 : i32, i32
  }
  func.func @transform_5(%arg0: i32) -> (i32, i32) {
    %c0_i32 = arith.constant 0 : i32
    %c0_i32_0 = arith.constant 0 : i32
    %c0_i32_1 = arith.constant 0 : i32
    return %c0_i32, %c0_i32_0 : i32, i32
  }
  func.func @transform_6(%arg0: i32) -> (i32, i32) {
    %c0_i32 = arith.constant 0 : i32
    %c0_i32_0 = arith.constant 0 : i32
    %c0_i32_1 = arith.constant 0 : i32
    return %c0_i32, %c0_i32_0 : i32, i32
  }
  func.func @transform_7(%arg0: i32) -> (i32, i32) {
    %c0_i32 = arith.constant 0 : i32
    %c0_i32_0 = arith.constant 0 : i32
    %c0_i32_1 = arith.constant 0 : i32
    return %c0_i32, %c0_i32_0 : i32, i32
  }
  func.func @transform_8(%arg0: i32) -> (i32, i32) {
    %c0_i32 = arith.constant 0 : i32
    %c0_i32_0 = arith.constant 0 : i32
    %c0_i32_1 = arith.constant 0 : i32
    return %c0_i32, %c0_i32_0 : i32, i32
  }
  func.func @transform_9(%arg0: i32) -> (i32, i32) {
    %c0_i32 = arith.constant 0 : i32
    %c0_i32_0 = arith.constant 0 : i32
    %c0_i32_1 = arith.constant 0 : i32
    return %c0_i32, %c0_i32_0 : i32, i32
  }
  func.func @transform_10(%arg0: i32) -> (i32, i32) {
    %c0_i32 = arith.constant 0 : i32
    %c0_i32_0 = arith.constant 0 : i32
    %c0_i32_1 = arith.constant 0 : i32
    return %c0_i32, %c0_i32_0 : i32, i32
  }
  func.func @transform_11(%arg0: i32) -> (i32, i32) {
    %c0_i32 = arith.constant 0 : i32
    %c0_i32_0 = arith.constant 0 : i32
    %c0_i32_1 = arith.constant 0 : i32
    return %c0_i32, %c0_i32_0 : i32, i32
  }
  func.func @transform_12(%arg0: i32) -> (i32, i32) {
    %c0_i32 = arith.constant 0 : i32
    %c0_i32_0 = arith.constant 0 : i32
    %c0_i32_1 = arith.constant 0 : i32
    return %c0_i32, %c0_i32_0 : i32, i32
  }
  func.func @transform_13(%arg0: i32) -> (i32, i32, i32) {
    %c0_i32 = arith.constant 0 : i32
    %c0_i32_0 = arith.constant 0 : i32
    %c0_i32_1 = arith.constant 0 : i32
    return %arg0, %c0_i32, %c0_i32_0 : i32, i32, i32
  }
}

</mosaic_0001>

<bundles_post_ra>
// kernel: tpu_custom_call.1
= control target key start
LH: loop header
LB: loop body
LE: loop exit
PB: predicated region body
PF: predicated region fallthrough
CT: control target
= control target key end

     0   :  { %s1742_s0 = inlined_call_operand.vmem [shape: f32[2,14,12], index: 0, kind: input, shape index: {}]   ;;  %s1743_s1 = inlined_call_operand.vmem [shape: f32[12,64], index: 1, kind: input, shape index: {}]   ;;  %s1744_s2 = inlined_call_operand.vmem [shape: f32[1,64], index: 2, kind: input, shape index: {}]   ;;  %s1745_s3 = inlined_call_operand.vmem [shape: f32[96,64], index: 3, kind: input, shape index: {}]   ;;  %s1746_s4 = inlined_call_operand.vmem [shape: f32[1,64], index: 4, kind: input, shape index: {}]   ;;  %s1747_s5 = inlined_call_operand.vmem [shape: f32[192,32], index: 5, kind: input, shape index: {}]   ;;  %s1748_s6 = inlined_call_operand.vmem [shape: f32[1,32], index: 6, kind: input, shape index: {}]   ;;  %s1749_s7 = inlined_call_operand.vmem [shape: f32[96,32], index: 7, kind: input, shape index: {}]   ;;  %s1750_s8 = inlined_call_operand.vmem [shape: f32[1,32], index: 8, kind: input, shape index: {}]   ;;  %s1751_s9 = inlined_call_operand.vmem [shape: f32[32,32], index: 9, kind: input, shape index: {}]   ;;  %s1752_s10 = inlined_call_operand.vmem [shape: f32[1,32], index: 10, kind: input, shape index: {}]   ;;  %s1753_s11 = inlined_call_operand.vmem [shape: f32[1,32], index: 11, kind: input, shape index: {}]   ;;  %s1754_s12 = inlined_call_operand.vmem [shape: f32[1,32], index: 12, kind: input, shape index: {}]   ;;  %s1755_s13 = inlined_call_operand.hbm [shape: f32[2,1,32], index: 13, kind: output, shape index: {}]  }
   0x1   :  { %1756 = sst [smem:[#allocation6_spill]] %s1742_s0 }
   0x2   :  { %1757 = sst [smem:[#allocation7_spill]] %s1743_s1 }
   0x3   :  { %1758 = sst [smem:[#allocation8_spill]] %s1744_s2 }
   0x4   :  { %18 = vsyncpa [#allocation3], 0 }
   0x5   :  { %20 = vsyncpa [#allocation3 + $0x1], 0  ;;  %s1418_s25 = smov 0   ;;  %s1420_s26 = smov 0  }
   0x6   :  { %s1422_s27 = smov 0   ;;  %s1424_s28 = smov 0  }
   0x7 LB: > { %s1439_s29 = sadd.s32 4294967295, %s1342_s28   ;;  %s1102_s30 = sadd.s32 4294967294, %s1342_s28   ;;  %s1342_s28 = sphi %s1424_s28, %s1769_s28   ;;  %s1338_s27 = sphi %s1422_s27, %s1768_s27   ;;  %s1334_s26 = sphi %s1420_s26, %s1767_s26   ;;  %s1330_s25 = sphi %s1418_s25, %s1766_s25  }
   0x8   : > { %s1443_s14 = sadd.s32 1, %s1342_s28   ;;  %s311_s15 = sadd.s32 1, %s1338_s27 }
   0x9   : > { %s308_s16 = ssub.s32 %s1342_s28, %s1443_s14  ;;  %p321_p0 = scmp.ne.s32.totalorder %s1338_s27, %s1334_s26 }
   0xa   : > { %p309_p1 = scmp.eq.s32.totalorder %s308_s16, 0  ;;  %p322_p2 = scmp.eq.s32.totalorder %s1439_s29, 1 }
   0xb   : > { %p327_p3 = scmp.ne.s32.totalorder %s1334_s26, %s1330_s25  ;;  %p328_p4 = scmp.eq.s32.totalorder %s1102_s30, 1 }
   0xc   : > { %s1454_s17 = scalar_select %p309_p1, %s1338_s27, %s311_s15  }
   0xd   : > { %p1456_p5 = por %p322_p2, %p321_p0  ;;  %p1460_p6 = por %p328_p4, %p327_p3 }
   0xe   : > { %1759 = sst [smem:[#allocation5_spill]] %s1454_s17  ;;  %p1105_p7 = scmp.ge.s32.totalorder %s1342_s28, 1 }
   0xf   : > { %p390_p8 = scmp.lt.s32.totalorder %s1342_s28, 3 }
  0x11   : > { %p391_p9 = pnand %p1105_p7, %p390_p8 }
  0x12   : > { %s1762_s1 = sld [smem:[#allocation7_spill]] (!%p391_p9)  ;;  %p433_p10 = scmp.lt.s32.totalorder (!%p391_p9), %s1439_s29, 1 }
  0x13   : > { %394 = sbr.rel (%p391_p9) target bundleno = 1426 (0x592), region = 72  ;;  %s1763_s0 = sld [smem:[#allocation6_spill]] (!%p391_p9) }
  0x14   : > { %s1764_s2 = sld [smem:[#allocation8_spill]] (!%p391_p9)  ;;  %s1346_s21 = smov (!%p391_p9), 32  }
  0x15   : > { %s431_s17 = sand.u32 (!%p391_p9), 1, %s1334_s26   ;;  %s1126_s16 = sshll.u32 (!%p391_p9), %s1439_s29, 4 }
  0x16   : > { %s1035_s23 = scalar_lea.sflag (!%p391_p9), [#allocation3], %s431_s17  ;;  %s1347_s15 = smov (!%p391_p9), [#allocation2]  }
  0x18   : > { %v441_v0 = vld [vmem:[%s1762_s1 + $0x8] sm:$0xf]  ;;  %vm456_vm0 = vcmask 1043456   ;;  %v440_v1 = vld [vmem:[%s1762_s1] sm:$0xff]  ;;  %s434_s24 = scalar_select %p433_p10, %s1439_s29, 1  ;;  %vm449_vm1 = vcmask 97280  }
  0x19   : > { %1168 = vmatprep.subr.msk.mxu0 %vm456_vm0, %v441_v0  ;;  %v563_v4 = vld [vmem:[%s1745_s3 + $0x58] sm:$0xff]  ;;  %v562_v5 = vld [vmem:[%s1745_s3 + $0x50] sm:$0xff]  ;;  %v561_v6 = vld [vmem:[%s1745_s3 + $0x48] sm:$0xff]  ;;  %vm539_vm2 = vcmask 1046528   ;;  %vm549_vm3 = vcmask 523264   ;;  %vm571_vm4 = vcmask 785408  }
  0x1a   : > { %1169 = vmatpush3.msk.msra.mxu0 %vm456_vm0, %v441_v0  ;;  %s1129_s30 = sshll.u32 %s434_s24, 4  ;;  %1175 = vmatprep.subr.mxu1 %v563_v4  ;;  %v560_v7 = vld [vmem:[%s1745_s3 + $0x40] sm:$0xff]  ;;  %v559_v8 = vld [vmem:[%s1745_s3 + $0x38] sm:$0xff]  ;;  %v558_v9 = vld [vmem:[%s1745_s3 + $0x30] sm:$0xff]  ;;  %v1345_v31 = vmov 0.0   ;;  %vm666_vm5 = vcmask 1045504  }
  0x1b   : > { %1170 = vmatprep.subr.mxu0 %v440_v1  ;;  %s437_s20 = scalar_lea.vmem %s1763_s0, %s1129_s30  ;;  %1176 = vmatpush3.msra.mxu1 %v563_v4  ;;  %v557_v10 = vld [vmem:[%s1745_s3 + $0x28] sm:$0xff]  ;;  %v556_v11 = vld [vmem:[%s1745_s3 + $0x20] sm:$0xff]  ;;  %v555_v12 = vld [vmem:[%s1745_s3 + $0x18] sm:$0xff]  ;;  %s1344_s30 = smov 64   ;;  %vm804_vm6 = vcmask 261120   ;;  %vm1024_vm7 = vcmask 253952  }
  0x1c   : > { %1171 = vmatpush3.msra.mxu0 %v440_v1  ;;  %v438_v2 = vld [vmem:[%s437_s20] sm:$0xff]  ;;  %v439_v3 = vld [vmem:[%s437_s20 + $0x8] sm:$0x3f]  ;;  %1177 = vmatprep.subr.mxu1 %v562_v5  ;;  %v554_v13 = vld [vmem:[%s1745_s3 + $0x10] sm:$0xff]  ;;  %s432_s20 = scalar_lea.vmem [#allocation2], %s431_s17  ;;  %s1286_s0 = sshll.u32 %s1347_s15, 4  ;;  %s1287_s0 = int_to_ptr.vmem [resolvable:$false] %s1286_s0 }
  0x1d   : > { %1172 = vmatprep.mubr.msk.f32.mxu0 %vm449_vm1, %v438_v2  ;;  %1178 = vmatpush3.msra.mxu1 %v562_v5  ;;  %v553_v14 = vld [vmem:[%s1745_s3 + $0x8] sm:$0xff]  ;;  %v1108_v15 = vld [vmem:[%s1764_s2] ss:$0 sm:$0xff]  ;;  %v687_v30 = vld [vmem:[%s1747_s5 + $0x78] sm:$0xff]  ;;  %s1288_s29 = scalar_lea.vmem %s1287_s0, 32 }
  0x1e   : > { %1173 = vmatmul.mubr.msk.f32.vlgmr.msra.gmra.mxu0 %vm449_vm1, %v439_v3  ;;  %1179 = vmatprep.subr.mxu1 %v561_v6  ;;  %v552_v16 = vld [vmem:[%s1745_s3] sm:$0xff]  ;;  %v686_v32 = vld [vmem:[%s1747_s5 + $0x70] sm:$0xff]  ;;  %v685_v33 = vld [vmem:[%s1747_s5 + $0x68] sm:$0xff] }
  0x1f   : > { %1180 = vmatpush3.msra.mxu1 %v561_v6  ;;  %707 = vmatprep.subr.mxu0 %v1345_v31  ;;  %v684_v34 = vld [vmem:[%s1747_s5 + $0x60] sm:$0xff]  ;;  %v683_v35 = vld [vmem:[%s1747_s5 + $0x58] sm:$0xff]  ;;  %v682_v36 = vld [vmem:[%s1747_s5 + $0x50] sm:$0xff] }
  0x20   : > { %1181 = vmatprep.subr.mxu1 %v560_v7  ;;  %708 = vmatpush1.msra.mxu0 %v687_v30  ;;  %v681_v37 = vld [vmem:[%s1747_s5 + $0x48] sm:$0xff]  ;;  %v680_v38 = vld [vmem:[%s1747_s5 + $0x40] sm:$0xff]  ;;  %v679_v39 = vld [vmem:[%s1747_s5 + $0x38] sm:$0xff] }
  0x21   : > { %1182 = vmatpush3.msra.mxu1 %v560_v7  ;;  %709 = vmatprep.subr.mxu0 %v1345_v31  ;;  %v678_v40 = vld [vmem:[%s1747_s5 + $0x30] sm:$0xff]  ;;  %v677_v41 = vld [vmem:[%s1747_s5 + $0x28] sm:$0xff]  ;;  %v676_v42 = vld [vmem:[%s1747_s5 + $0x20] sm:$0xff] }
  0x22   : > { %1183 = vmatprep.subr.mxu1 %v559_v8  ;;  %710 = vmatpush1.msra.mxu0 %v686_v32  ;;  %v675_v43 = vld [vmem:[%s1747_s5 + $0x18] sm:$0xff]  ;;  %v674_v44 = vld [vmem:[%s1747_s5 + $0x10] sm:$0xff]  ;;  %v673_v45 = vld [vmem:[%s1747_s5 + $0x8] sm:$0xff] }
  0x23   : > { %1184 = vmatpush3.msra.mxu1 %v559_v8  ;;  %711 = vmatprep.subr.mxu0 %v1345_v31  ;;  %v672_v46 = vld [vmem:[%s1747_s5] sm:$0xff]  ;;  %v695_v47 = vld [vmem:[%s1747_s5 + $0xb8] sm:$0xff]  ;;  %v694_v48 = vld [vmem:[%s1747_s5 + $0xb0] sm:$0xff] }
  0x24   : > { %1185 = vmatprep.subr.mxu1 %v558_v9  ;;  %712 = vmatpush1.msra.mxu0 %v685_v33  ;;  %v693_v49 = vld [vmem:[%s1747_s5 + $0xa8] sm:$0xff]  ;;  %v692_v50 = vld [vmem:[%s1747_s5 + $0xa0] sm:$0xff]  ;;  %v691_v51 = vld [vmem:[%s1747_s5 + $0x98] sm:$0xff] }
  0x25   : > { %1186 = vmatpush3.msra.mxu1 %v558_v9  ;;  %713 = vmatprep.subr.mxu0 %v1345_v31  ;;  %v690_v52 = vld [vmem:[%s1747_s5 + $0x90] sm:$0xff]  ;;  %v689_v53 = vld [vmem:[%s1747_s5 + $0x88] sm:$0xff]  ;;  %v688_v54 = vld [vmem:[%s1747_s5 + $0x80] sm:$0xff] }
  0x26   : > { %1187 = vmatprep.subr.mxu1 %v557_v10  ;;  %714 = vmatpush1.msra.mxu0 %v684_v34  ;;  %v1112_v55 = vld [vmem:[%s1746_s4] ss:$0 sm:$0xff]  ;;  %v820_v8 = vld [vmem:[%s1749_s7 + $0x58] sm:$0xff]  ;;  %v819_v9 = vld [vmem:[%s1749_s7 + $0x50] sm:$0xff] }
  0x27   : > { %1188 = vmatpush3.msra.mxu1 %v557_v10  ;;  %715 = vmatprep.subr.mxu0 %v1345_v31  ;;  %v818_v10 = vld [vmem:[%s1749_s7 + $0x48] sm:$0xff] }
  0x28   : > { %1189 = vmatprep.subr.mxu1 %v556_v11  ;;  %716 = vmatpush1.msra.mxu0 %v683_v35 }
  0x29   : > { %1190 = vmatpush3.msra.mxu1 %v556_v11  ;;  %717 = vmatprep.subr.mxu0 %v1345_v31  ;;  %v817_v11 = vld [vmem:[%s1749_s7 + $0x40] sm:$0xff] }
  0x2a   : > { %1191 = vmatprep.subr.mxu1 %v555_v12  ;;  %718 = vmatpush1.msra.mxu0 %v682_v36 }
  0x2b   : > { %1192 = vmatpush3.msra.mxu1 %v555_v12  ;;  %719 = vmatprep.subr.mxu0 %v1345_v31  ;;  %v816_v12 = vld [vmem:[%s1749_s7 + $0x38] sm:$0xff] }
  0x2c   : > { %1193 = vmatprep.subr.mxu1 %v554_v13  ;;  %720 = vmatpush1.msra.mxu0 %v681_v37 }
  0x2d   : > { %1194 = vmatpush3.msra.mxu1 %v554_v13  ;;  %721 = vmatprep.subr.mxu0 %v1345_v31  ;;  %v815_v13 = vld [vmem:[%s1749_s7 + $0x30] sm:$0xff] }
  0x2e   : > { %1195 = vmatprep.subr.mxu1 %v553_v14  ;;  %722 = vmatpush1.msra.mxu0 %v680_v38 }
  0x2f   : > { %1196 = vmatpush3.msra.mxu1 %v553_v14  ;;  %723 = vmatprep.subr.mxu0 %v1345_v31  ;;  %v814_v14 = vld [vmem:[%s1749_s7 + $0x28] sm:$0xff] }
  0x30   : > { %1197 = vmatprep.subr.mxu1 %v552_v16  ;;  %724 = vmatpush1.msra.mxu0 %v679_v39 }
  0x31   : > { %1198 = vmatpush3.msra.mxu1 %v552_v16  ;;  %725 = vmatprep.subr.mxu0 %v1345_v31  ;;  %v812_v16 = vld [vmem:[%s1749_s7 + $0x18] sm:$0xff] }
  0x32   : > { %726 = vmatpush1.msra.mxu0 %v678_v40  ;;  %1202 = vmatprep.subr.mxu1 %v820_v8 }
  0x33   : > { %727 = vmatprep.subr.mxu0 %v1345_v31 }
  0x34   : > { %728 = vmatpush1.msra.mxu0 %v677_v41 }
  0x35   : > { %729 = vmatprep.subr.mxu0 %v1345_v31 }
  0x36   : > { %730 = vmatpush1.msra.mxu0 %v676_v42 }
  0x37   : > { %731 = vmatprep.subr.mxu0 %v1345_v31 }
  0x38   : > { %732 = vmatpush1.msra.mxu0 %v675_v43  ;;  %v914_v43 = vld [vmem:[%s1751_s9 + $0x18] sm:$0xff] }
  0x39   : > { %733 = vmatprep.subr.mxu0 %v1345_v31 }
  0x3a   : > { %734 = vmatpush1.msra.mxu0 %v674_v44  ;;  %v913_v44 = vld [vmem:[%s1751_s9 + $0x10] sm:$0xff] }
  0x3b   : > { %735 = vmatprep.subr.mxu0 %v1345_v31 }
  0x3c   : > { %736 = vmatpush1.msra.mxu0 %v673_v45  ;;  %v912_v45 = vld [vmem:[%s1751_s9 + $0x8] sm:$0xff] }
  0x3d   : > { %737 = vmatprep.subr.mxu0 %v1345_v31 }
  0x3e   : > { %738 = vmatpush1.msra.mxu0 %v672_v46  ;;  %v911_v46 = vld [vmem:[%s1751_s9] sm:$0xff] }
  0x3f   : > { %755 = vmatprep.subr.mxu0 %v1345_v31 }
  0x40   : > { %756 = vmatpush2.msra.mxu0 %v695_v47  ;;  %v1118_v47 = vld [vmem:[%s1750_s8] ss:$0 sm:$0xff] }
  0x41   : > { %757 = vmatprep.subr.mxu0 %v1345_v31 }
  0x42   : > { %758 = vmatpush2.msra.mxu0 %v694_v48 }
  0x43   : > { %759 = vmatprep.subr.mxu0 %v1345_v31 }
  0x44   : > { %760 = vmatpush2.msra.mxu0 %v693_v49 }
  0x45   : > { %761 = vmatprep.subr.mxu0 %v1345_v31 }
  0x46   : > { %762 = vmatpush2.msra.mxu0 %v692_v50 }
  0x47   : > { %763 = vmatprep.subr.mxu0 %v1345_v31 }
  0x48   : > { %764 = vmatpush2.msra.mxu0 %v691_v51 }
  0x49   : > { %765 = vmatprep.subr.mxu0 %v1345_v31 }
  0x4a   : > { %766 = vmatpush2.msra.mxu0 %v690_v52 }
  0x4b   : > { %767 = vmatprep.subr.mxu0 %v1345_v31 }
  0x4c   : > { %768 = vmatpush2.msra.mxu0 %v689_v53 }
  0x4d   : > { %769 = vmatprep.subr.mxu0 %v1345_v31 }
  0x4e   : > { %770 = vmatpush2.msra.mxu0 %v688_v54  ;;  %v1121_v54 = vld [vmem:[%s1752_s10] ss:$0 sm:$0xff] }
  0xde   : > { %v1174_v17 = vpop.f32.mrf.mxu0 }
  0xdf   : > { %v532_v18 = vadd.f32 %v1174_v17, %v1108_v15  ;;  %v1115_v17 = vld [vmem:[%s1748_s6] ss:$0 sm:$0xff] }
  0xe0   : > { %v526_v19 = vpop.f32.mrf.mxu0 }
  0xe1   : > { %v536_v20 = vmax.f32 %v532_v18, 0.0  ;;  %v527_v21 = vadd.f32 %v1108_v15, %v526_v19  ;;  %v813_v15 = vld [vmem:[%s1749_s7 + $0x20] sm:$0xff]  ;;  %v811_v18 = vld [vmem:[%s1749_s7 + $0x10] sm:$0xff]  ;;  %v810_v19 = vld [vmem:[%s1749_s7 + $0x8] sm:$0xff] }
  0xe3   : > { %v535_v22 = vmax.f32 %v527_v21, 0.0  ;;  %v541_v23 = vrot.slane %v536_v20, 1 }
  0xe5   : > { %v540_v24 = vrot.slane %v535_v22, 1 }
  0xe7   : > { %v542_v25 = vsel %vm539_vm2, %v540_v24, %v541_v23 }
  0xe8   : > { %543 = vrot.lane.b32.xlu0 %v542_v25, %s1344_s30 }
  0xec   : > { %545 = vrot.lane.b32.xlu0 %v541_v23, %s1344_s30  ;;  %v809_v23 = vld [vmem:[%s1749_s7] sm:$0xff] }
 0x15a   : > { %v544_v26 = vpop.permute.xlu0 %543 }
 0x15b   : > { %v550_v27 = vsel %vm549_vm3, %v535_v22, %v544_v26 }
 0x15c   : > { %1199 = vmatprep.mubr.msk.f32.mxu1 %vm571_vm4, %v550_v27 }
 0x15e   : > { %v546_v28 = vpop.permute.xlu0 %545 }
 0x15f   : > { %v551_v29 = vsel %vm549_vm3, %v536_v20, %v546_v28 }
 0x160   : > { %1200 = vmatmul.mubr.msk.f32.vlgmr.msra.gmra.mxu1 %vm571_vm4, %v551_v29 }
 0x161   : > { %1203 = vmatpush3.msra.mxu1 %v820_v8 }
 0x162   : > { %1204 = vmatprep.subr.mxu1 %v819_v9 }
 0x163   : > { %1205 = vmatpush3.msra.mxu1 %v819_v9 }
 0x164   : > { %1206 = vmatprep.subr.mxu1 %v818_v10 }
 0x165   : > { %1207 = vmatpush3.msra.mxu1 %v818_v10 }
 0x166   : > { %1208 = vmatprep.subr.mxu1 %v817_v11 }
 0x167   : > { %1209 = vmatpush3.msra.mxu1 %v817_v11 }
 0x168   : > { %1210 = vmatprep.subr.mxu1 %v816_v12 }
 0x169   : > { %1211 = vmatpush3.msra.mxu1 %v816_v12 }
 0x16a   : > { %1212 = vmatprep.subr.mxu1 %v815_v13 }
 0x16b   : > { %1213 = vmatpush3.msra.mxu1 %v815_v13 }
 0x16c   : > { %1214 = vmatprep.subr.mxu1 %v814_v14 }
 0x16d   : > { %1215 = vmatpush3.msra.mxu1 %v814_v14 }
 0x16e   : > { %1216 = vmatprep.subr.mxu1 %v813_v15 }
 0x16f   : > { %1217 = vmatpush3.msra.mxu1 %v813_v15 }
 0x170   : > { %1218 = vmatprep.subr.mxu1 %v812_v16 }
 0x171   : > { %1219 = vmatpush3.msra.mxu1 %v812_v16 }
 0x172   : > { %1220 = vmatprep.subr.mxu1 %v811_v18 }
 0x173   : > { %1221 = vmatpush3.msra.mxu1 %v811_v18 }
 0x174   : > { %1222 = vmatprep.subr.mxu1 %v810_v19 }
 0x175   : > { %1223 = vmatpush3.msra.mxu1 %v810_v19 }
 0x176   : > { %1224 = vmatprep.subr.mxu1 %v809_v23 }
 0x177   : > { %1225 = vmatpush3.msra.mxu1 %v809_v23 }
 0x178   : > { %1229 = vmatprep.subr.mxu1 %v914_v43 }
 0x220   : > { %v1201_v56 = vpop.f32.mrf.mxu1 }
 0x221   : > { %v650_v57 = vadd.f32 %v1201_v56, %v1112_v55 }
 0x222   : > { %v644_v58 = vpop.f32.mrf.mxu1 }
 0x223   : > { %v654_v59 = vmax.f32 %v650_v57, 0.0  ;;  %v645_v60 = vadd.f32 %v1112_v55, %v644_v58  ;;  %v1124_v57 = vld [vmem:[%s1753_s11] ss:$0 sm:$0xff] }
 0x225   : > { %v653_v61 = vmax.f32 %v645_v60, 0.0  ;;  %v668_v62 = vrot.slane %v654_v59, 2  ;;  %v658_v1 = vrot.slane %v654_v59, 1 }
 0x227   : > { %v667_v63 = vrot.slane %v653_v61, 2  ;;  %v657_v0 = vrot.slane %v653_v61, 1 }
 0x229   : > { %v669_v2 = vsel %vm666_vm5, %v667_v63, %v668_v62  ;;  %v659_v3 = vsel %vm539_vm2, %v657_v0, %v658_v1 }
 0x22a   : > { %1116 = vmatprep.mubr.msk.f32.mxu0 %vm549_vm3, %v669_v2  ;;  %660 = vrot.lane.b32.xlu1 %v659_v3, %s1344_s30 }
 0x22e   : > { %662 = vrot.lane.b32.xlu1 %v658_v1, %s1344_s30 }
 0x29c   : > { %v661_v4 = vpop.permute.xlu1 %660 }
 0x29d   : > { %v670_v5 = vsel %vm549_vm3, %v653_v61, %v661_v4  ;;  %v1125_v61 = vld [vmem:[%s1754_s12] ss:$0 sm:$0xff] }
 0x29e   : > { %772 = vmatmul.mubr.f32.vlgmr.msra.gmra.mxu0 %v670_v5 }
 0x29f   : > { %1117 = vmatprep.mubr.msk.f32.mxu0 %vm549_vm3, %v668_v62 }
 0x2a0   : > { %v663_v6 = vpop.permute.xlu1 %662 }
 0x2a1   : > { %v671_v7 = vsel %vm549_vm3, %v654_v59, %v663_v6 }
 0x2a2   : > { %777 = vmatmul.mubr.f32.gmra.mxu0 %v671_v7 }
 0x35e   : > { %v773_v20 = vpop.f32.mrf.mxu0 }
 0x35f   : > { %v774_v21 = vadd.f32 %v1115_v17, %v773_v20 }
 0x360   : > { %v775_v22 = vpop.f32.mrf.mxu0 }
 0x361   : > { %v782_v25 = vmax.f32 %v774_v21, 0.0 }
 0x362   : > { %v778_v24 = vpop.f32.mrf.mxu0 }
 0x363   : > { %v779_v26 = vadd.f32 %v1115_v17, %v778_v24  ;;  %v786_v29 = vrot.slane %v782_v25, 1  ;;  %v795_v33 = vrot.slane %v782_v25, 2 }
 0x364   : > { %v780_v27 = vpop.f32.mrf.mxu0 }
 0x365   : > { %v783_v28 = vmax.f32 %v779_v26, 0.0 }
 0x367   : > { %v787_v30 = vrot.slane %v783_v28, 1  ;;  %v796_v32 = vrot.slane %v783_v28, 2 }
 0x369   : > { %791 = vrot.lane.b32.xlu1 %v787_v30, %s1346_s21  ;;  %v788_v31 = vsel %vm539_vm2, %v786_v29, %v787_v30  ;;  %v797_v34 = vsel %vm666_vm5, %v795_v33, %v796_v32 }
 0x36a   : > { %789 = vrot.lane.b32.xlu0 %v788_v31, %s1346_s21  ;;  %s1047_s21 = sshll.u32 %s432_s20, 4  ;;  %s1048_s21 = int_to_ptr.vmem [resolvable:$true] %s1047_s21 }
 0x36b   : > { %s1282_s24 = scalar_lea.vmem %s1048_s21, 16  ;;  %p1289_p0 = scmp.lt.s32.totalorder %s1048_s21, %s1287_s0 }
 0x36c   : > { %p1283_p11 = scmp.ne.s32.totalorder %s1048_s21, %s1282_s24  ;;  %p1290_p1 = scmp.lt.s32.totalorder %s1288_s29, %s1282_s24 }
 0x36d   : > { %800 = vrot.lane.b32.xlu1 %v796_v32, %s1344_s30 }
 0x36e   : > { %798 = vrot.lane.b32.xlu0 %v797_v34, %s1344_s30  ;;  %s1045_s30 = scalar_lea.hbm %s1755_s13, %s1126_s16  ;;  %p1284_p12 = pnand %p1283_p11, %p1456_p5 }
 0x36f   : > { %p1291_p2 = por %p1290_p1, %p1289_p0 }
 0x370   : > { %p1285_p13 = pneg %p1284_p12 }
 0x372   : > { %p1292_p3 = pnand %p1291_p2, %p1285_p13 }
 0x3db   : > { %v792_v35 = vpop.permute.xlu1 %791 }
 0x3dc   : > { %v790_v36 = vpop.permute.xlu0 %789  ;;  %v806_v40 = vsel %vm804_vm6, %v783_v28, %v792_v35 }
 0x3dd   : > { %v805_v38 = vsel %vm804_vm6, %v782_v25, %v790_v36 }
 0x3df   : > { %v801_v37 = vpop.permute.xlu1 %800 }
 0x3e0   : > { %v799_v39 = vpop.permute.xlu0 %798  ;;  %v808_v42 = vsel %vm549_vm3, %v806_v40, %v801_v37 }
 0x3e1   : > { %v807_v41 = vsel %vm549_vm3, %v805_v38, %v799_v39 }
 0x3e2   : > { %1226 = vmatprep.mubr.msk.f32.mxu1 %vm571_vm4, %v807_v41 }
 0x3e3   : > { %1227 = vmatmul.mubr.msk.f32.vlgmr.msra.gmra.mxu1 %vm571_vm4, %v808_v42 }
 0x3e4   : > { %1230 = vmatpush3.msra.mxu1 %v914_v43 }
 0x3e5   : > { %1231 = vmatprep.subr.mxu1 %v913_v44 }
 0x3e6   : > { %1232 = vmatpush3.msra.mxu1 %v913_v44 }
 0x3e7   : > { %1233 = vmatprep.subr.mxu1 %v912_v45 }
 0x3e8   : > { %1234 = vmatpush3.msra.mxu1 %v912_v45 }
 0x3e9   : > { %1235 = vmatprep.subr.mxu1 %v911_v46 }
 0x3ea   : > { %1236 = vmatpush3.msra.mxu1 %v911_v46 }
 0x4a3   : > { %v1228_v48 = vpop.f32.mrf.mxu1 }
 0x4a4   : > { %v906_v49 = vadd.f32 %v1228_v48, %v1118_v47 }
 0x4a5   : > { %v900_v50 = vpop.f32.mrf.mxu1 }
 0x4a6   : > { %v901_v51 = vadd.f32 %v1118_v47, %v900_v50  ;;  %v910_v53 = vmax.f32 %v906_v49, 0.0 }
 0x4a8   : > { %v909_v52 = vmax.f32 %v901_v51, 0.0 }
 0x4aa   : > { %1237 = vmatprep.mubr.msk.f32.mxu1 %vm804_vm6, %v909_v52 }
 0x4ab   : > { %1238 = vmatmul.mubr.msk.f32.vlgmr.msra.gmra.mxu1 %vm804_vm6, %v910_v53 }
 0x56b   : > { %v1239_v55 = vpop.f32.mrf.mxu1 }
 0x56c   : > { %v1000_v56 = vadd.f32 %v1239_v55, %v1121_v54 }
 0x56d   : > { %v994_v58 = vpop.f32.mrf.mxu1 }
 0x56e   : > { %v1004_v59 = vmax.f32 %v1000_v56, 0.0  ;;  %v995_v60 = vadd.f32 %v1121_v54, %v994_v58 }
 0x570   : > { %v1013_v62 = vmul.f32 %v1124_v57, %v1004_v59  ;;  %v1003_v63 = vmax.f32 %v995_v60, 0.0 }
 0x572   : > { %v1022_v0 = vadd.f32 %v1125_v61, %v1013_v62  ;;  %v1012_v1 = vmul.f32 %v1124_v57, %v1003_v63 }
 0x574   : > { %v1021_v2 = vadd.f32 %v1125_v61, %v1012_v1  ;;  %v1025_v4 = vsel %vm1024_vm7, %v1022_v0, -inf }
 0x576   : > { %v1023_v3 = vsel %vm804_vm6, %v1021_v2, -inf }
 0x577   : > { %v1026_v5 = vmax.f32 %v1023_v3, %v1025_v4 }
 0x579   : > { %v1027_v6 = vrot.slane %v1026_v5, 4 }
 0x57b   : > { %v1028_v7 = vmax.f32 %v1026_v5, %v1027_v6 }
 0x57d   : > { %v1029_v8 = vrot.slane %v1028_v7, 2 }
 0x57f   : > { %v1030_v9 = vmax.f32 %v1028_v7, %v1029_v8 }
 0x581   : > { %v1031_v10 = vrot.slane %v1030_v9, 1 }
 0x583   : > { %v1032_v11 = vmax.f32 %v1030_v9, %v1031_v10 }
 0x585   : > { %1033 = vst.msk [vmem:[%s432_s20] sm:$0x1] %vm1024_vm7, %v1032_v11 }
 0x586   : > { %1295 = shalt.err (!%p1292_p3)
}
 0x587   : > { %s1296_s1 = scalar_lea.hbm %s1045_s30, 16  ;;  %s1300_s20 = scalar_lea.hbm %s1755_s13, 32 }
 0x588   : > { %p1297_p4 = scmp.ne.s32.totalorder %s1045_s30, %s1296_s1  ;;  %p1301_p9 = scmp.lt.s32.totalorder %s1045_s30, %s1755_s13 }
 0x589   : > { %p1302_p10 = scmp.lt.s32.totalorder %s1300_s20, %s1296_s1 }
 0x58a   : > { %p1298_p7 = pnand %p1297_p4, %p1456_p5 }
 0x58b   : > { %p1303_p11 = por %p1302_p10, %p1301_p9 }
 0x58c   : > { %p1299_p8 = pneg %p1298_p7 }
 0x58e   : > { %p1304_p12 = pnand %p1303_p11, %p1299_p8 }
 0x590   : > { %1307 = shalt.err (!%p1304_p12)
}
 0x591   : > { %1240 = dma.vmem_to_hbm [thread:$0]  (%p1456_p5), %s1048_s21, 16, %s1045_s30, %s1035_s23  }
 0x592 PF: > { %p1246_p13 = scmp.ge.s32.totalorder %s1342_s28, 2  ;;  %s1059_s0 = sand.u32 1, %s1330_s25  }
 0x593   : > { %s1060_s24 = scalar_lea.sflag [#allocation3], %s1059_s0 }
 0x594   : > { %p1243_p0 = pnand %p1246_p13, %p1460_p6 }
 0x596   : > { %p1244_p1 = pneg %p1243_p0 }
 0x598   : > { %1325 = dma.done.wait (%p1244_p1), %s1060_s24, 16  }
 0x599   : > { %1327 = vsyncadd (%p1244_p1), %s1060_s24, 4294967280  ;;  %s1765_s2 = sld [smem:[#allocation5_spill]]  ;;  %p23_p2 = scmp.ge.s32.totalorder %s1443_s14, 4  }
 0x59a   : > { %s1766_s25 = smov %s1334_s26  ;;  %s1767_s26 = smov %s1338_s27 }
 0x59b   : > { %s1769_s28 = smov %s1443_s14  ;;  %25 = sbr.rel (!%p23_p2) target bundleno = 7 (0x7), region = 107 }
 0x59f   : > { %s1768_s27 = smov %s1765_s2 }
 0x5a0   :  { %1064 = vsyncpa [#allocation3], 1 }
 0x5a1   :  { %1066 = vsyncpa [#allocation3 + $0x1], 1 }

</bundles_post_ra>
